<compile_context>
chip_gen: v7x
topology: tpu7x:2x2x1
jax: 0.10.0
libtpu: 0.0.40
codegen_flags: <defaults>
</compile_context>

<pallas_src>
import functools

import jax
import jax.numpy as jnp
from jax.experimental import pallas as pl
from jax.experimental.pallas import tpu as pltpu


def _pairwise_interaction_kernel(x_ref, o_ref, *, num_fields, emb_dim):
    """x_ref: (tb, num_fields * emb_dim) block; o_ref: (tb, 1) block."""
    # Stream over fields with static lane slices; accumulate in f32 so bf16
    # inputs still get full-precision accumulation.
    x0 = x_ref[:, 0:emb_dim].astype(jnp.float32)
    s = x0                       # (tb, D)  running sum over fields
    ssq = x0 * x0                # (tb, D)  running sum of squares
    for f in range(1, num_fields):
        xf = x_ref[:, f * emb_dim:(f + 1) * emb_dim].astype(jnp.float32)
        s = s + xf
        ssq = ssq + xf * xf
    # 0.5 * sum_d (s_d^2 - ssq_d)   ->  (tb, 1)
    out = 0.5 * jnp.sum(s * s - ssq, axis=1, keepdims=True)
    o_ref[...] = out.astype(o_ref.dtype)


def _round_up(x, m):
    return -(-x // m) * m


def _vmem_limit_bytes():
    """Scoped-VMEM limit to request: ~3/4 of physical, capped at 96 MiB."""
    cap = 64 << 20  # conservative fallback = v7x per-TC physical VMEM
    try:
        cap = int(pltpu.get_tpu_info().vmem_capacity_bytes)
    except Exception:  # pragma: no cover - info query unavailable
        pass
    return int(min(max(cap * 3 // 4, 32 << 20), 96 << 20))


def _choose_batch_tile(B, fd, d, *, in_itemsize, out_itemsize, vmem_limit):
    """Pick a batch tile (multiple of 8, or == B) from a VMEM working-set budget."""
    padded_fd = _round_up(fd, 128)            # input row pads lanes to 128
    padded_d = _round_up(d, 128)              # f32 accumulators pad lanes to 128
    in_row = padded_fd * in_itemsize          # one input buffer, per batch row
    acc_row = 4 * padded_d * 4                # s, ssq, xf and one product temp (f32)
    out_row = 128 * out_itemsize              # (tb, 1) output block pads lanes to 128
    row_bytes = 2 * in_row + acc_row + 2 * out_row   # in/out are double-buffered

    # Per-step input payload target scales with VMEM (fallback/v7x ~12 MiB,
    # 128-MiB parts up to 16 MiB); the total working set keeps ~8 MiB headroom
    # under the scoped limit for compiler scratch.
    target_in = max(4 << 20, min(16 << 20, vmem_limit // 4))
    work_budget = max(8 << 20, vmem_limit - (8 << 20))

    tb = min(target_in // in_row, work_budget // row_bytes)
    tb = max(8, (tb // 8) * 8)

    if tb >= B:
        # Whole batch fits comfortably: still split into ~4 pipelined grid
        # steps so DMA overlaps compute/writeback and multi-TC parts can shard
        # the parallel batch axis.
        return int(min(B, max(8, _round_up(pl.cdiv(B, 4), 8))))
    return int(tb)


def pairwise_interaction(x, *, batch_tile=None):
    """FM pairwise interaction.

    :param x: (batch, num_fields, embedding_dim)  (f32 or bf16)
    :return : (batch, 1) in x.dtype
    """
    B, F, D = x.shape
    fd = F * D
    # Free, contiguous reshape: one dense lane-major slab per batch row.
    x2 = x.reshape(B, fd)

    vmem_limit = _vmem_limit_bytes()
    itemsize = jnp.dtype(x.dtype).itemsize
    if batch_tile is None:
        batch_tile = _choose_batch_tile(
            B, fd, D,
            in_itemsize=itemsize, out_itemsize=itemsize,
            vmem_limit=vmem_limit)
    batch_tile = int(min(max(int(batch_tile), 1), B))
    if batch_tile < B:
        batch_tile = max(8, (batch_tile // 8) * 8)  # sublane alignment

    # Partial trailing block (B % batch_tile != 0) is masked by Pallas: padded
    # input rows are undefined but row-independent, and their outputs are
    # discarded on writeback.
    grid = (pl.cdiv(B, batch_tile),)

    kernel = functools.partial(
        _pairwise_interaction_kernel, num_fields=F, emb_dim=D)

    return pl.pallas_call(
        kernel,
        out_shape=jax.ShapeDtypeStruct((B, 1), x.dtype),
        grid_spec=pltpu.PrefetchScalarGridSpec(
            num_scalar_prefetch=0,
            grid=grid,
            in_specs=[pl.BlockSpec((batch_tile, fd), lambda i: (i, 0))],
            out_specs=pl.BlockSpec((batch_tile, 1), lambda i: (i, 0)),
        ),
        compiler_params=pltpu.CompilerParams(
            # Pure batch parallelism: lets multi-TC parts shard grid steps.
            dimension_semantics=("parallel",),
            vmem_limit_bytes=vmem_limit,
        ),
    )(x2)


def _reference(x):
    x = x.astype(jnp.float32)
    square_of_sum = jnp.square(jnp.sum(x, axis=1))
    sum_of_square = jnp.sum(jnp.square(x), axis=1)
    return 0.5 * jnp.sum(square_of_sum - sum_of_square, axis=1, keepdims=True)


if __name__ == "__main__":
    # 1) Module-spec shape: (batch=2, num_fields=4, embedding_dim=16).
    x_small = jax.random.normal(jax.random.PRNGKey(0), (2, 4, 16), dtype=jnp.float32)
    out_small = jax.block_until_ready(pairwise_interaction(x_small))
    ref_small = _reference(x_small)
    assert out_small.shape == (2, 1), out_small.shape
    assert jnp.allclose(out_small, ref_small, atol=1e-3, rtol=1e-4), (
        out_small, ref_small)

    # 2) Larger shape exercising the multi-step pipelined path, including a
    #    batch that is not a multiple of the tile (masked trailing block).
    x_big = jax.random.normal(jax.random.PRNGKey(0), (200, 8, 128), dtype=jnp.float32)
    out_big = jax.block_until_ready(pairwise_interaction(x_big))
    ref_big = _reference(x_big)
    assert out_big.shape == (200, 1), out_big.shape
    assert jnp.allclose(out_big, ref_big, atol=1e-2, rtol=1e-4)

    # 3) bf16 input path (half the HBM traffic; accumulation stays f32).
    x_bf16 = jax.random.normal(jax.random.PRNGKey(1), (64, 4, 32),
                               dtype=jnp.float32).astype(jnp.bfloat16)
    out_bf16 = jax.block_until_ready(pairwise_interaction(x_bf16))
    ref_bf16 = _reference(x_bf16)
    assert out_bf16.shape == (64, 1), out_bf16.shape
    assert jnp.allclose(out_bf16.astype(jnp.float32), ref_bf16,
                        atol=5e-2, rtol=5e-2)

    print("KERNEL_OK")
</pallas_src>

<mosaic_0001>
module attributes {stable_mosaic.version = 11 : i64} {
  func.func @_pairwise_interaction_kernel(%arg0: i32, %arg1: memref<2x64xf32, #tpu.memory_space<vmem>>, %arg2: memref<2x1xf32, #tpu.memory_space<vmem>>) attributes {dimension_semantics = [#tpu.dimension_semantics<parallel>], iteration_bounds = array<i64: 1>, scalar_prefetch = 0 : i64, scratch_operands = 0 : i64, tpu.core_type = #tpu.core_type<tc>, window_params = [{transform_indices = @transform_0, window_bounds = array<i64: 2, 64>}, {transform_indices = @transform_1, window_bounds = array<i64: 2, 1>}]} {
    %c0 = arith.constant 0 : index
    %c0_0 = arith.constant 0 : index
    %0 = vector.load %arg1[%c0, %c0_0] : memref<2x64xf32, #tpu.memory_space<vmem>>, vector<2x16xf32>
    %1 = arith.mulf %0, %0 : vector<2x16xf32>
    %c0_1 = arith.constant 0 : index
    %c16 = arith.constant 16 : index
    %2 = vector.load %arg1[%c0_1, %c16] : memref<2x64xf32, #tpu.memory_space<vmem>>, vector<2x16xf32>
    %3 = arith.addf %0, %2 : vector<2x16xf32>
    %4 = arith.mulf %2, %2 : vector<2x16xf32>
    %5 = arith.addf %1, %4 : vector<2x16xf32>
    %c0_2 = arith.constant 0 : index
    %c32 = arith.constant 32 : index
    %6 = vector.load %arg1[%c0_2, %c32] : memref<2x64xf32, #tpu.memory_space<vmem>>, vector<2x16xf32>
    %7 = arith.addf %3, %6 : vector<2x16xf32>
    %8 = arith.mulf %6, %6 : vector<2x16xf32>
    %9 = arith.addf %5, %8 : vector<2x16xf32>
    %c0_3 = arith.constant 0 : index
    %c48 = arith.constant 48 : index
    %10 = vector.load %arg1[%c0_3, %c48] : memref<2x64xf32, #tpu.memory_space<vmem>>, vector<2x16xf32>
    %11 = arith.addf %7, %10 : vector<2x16xf32>
    %12 = arith.mulf %10, %10 : vector<2x16xf32>
    %13 = arith.addf %9, %12 : vector<2x16xf32>
    %14 = arith.mulf %11, %11 : vector<2x16xf32>
    %15 = arith.subf %14, %13 : vector<2x16xf32>
    %cst = arith.constant dense<0.000000e+00> : vector<2xf32>
    %16 = vector.multi_reduction <add>, %15, %cst [1] : vector<2x16xf32> to vector<2xf32>
    %17 = vector.shape_cast %16 : vector<2xf32> to vector<2x1xf32>
    %cst_4 = arith.constant 5.000000e-01 : f32
    %18 = vector.broadcast %cst_4 : f32 to vector<2x1xf32>
    %19 = arith.mulf %18, %17 : vector<2x1xf32>
    %c0_5 = arith.constant 0 : index
    %c0_6 = arith.constant 0 : index
    %20 = vector.load %arg2[%c0_5, %c0_6] : memref<2x1xf32, #tpu.memory_space<vmem>>, vector<2x1xf32>
    tpu.vector_store %arg2[%c0_5, %c0_6], %19 {strides = array<i32>} : memref<2x1xf32, #tpu.memory_space<vmem>>, vector<2x1xf32>,
    return
  }
  func.func @transform_0(%arg0: i32) -> (i32, i32) {
    %c0_i32 = arith.constant 0 : i32
    %c0_i32_0 = arith.constant 0 : i32
    return %arg0, %c0_i32 : i32, i32
  }
  func.func @transform_1(%arg0: i32) -> (i32, i32) {
    %c0_i32 = arith.constant 0 : i32
    %c0_i32_0 = arith.constant 0 : i32
    return %arg0, %c0_i32 : i32, i32
  }
}

</mosaic_0001>

<bundles_post_ra>
// kernel: tpu_custom_call.1
= control target key start
LH: loop header
LB: loop body
LE: loop exit
PB: predicated region body
PF: predicated region fallthrough
CT: control target
= control target key end

     0   :  { %6 = vsyncpa [#allocation3], 0  ;;  %s90_s6 = smov [#allocation2]   ;;  %s119_s0 = inlined_call_operand.hbm [shape: f32[2,64], index: 0, kind: input, shape index: {}]   ;;  %s120_s1 = inlined_call_operand.vmem [shape: f32[2,1], index: 1, kind: output, shape index: {}]  }
   0x1   :  { %s13_s7 = sshll.u32 %s90_s6, 4  ;;  %s66_s10 = scalar_lea.hbm %s119_s0, 32  ;;  %s14_s7 = int_to_ptr.vmem [resolvable:$true] %s13_s7 }
   0x2   :  { %p67_p0 = scmp.ne.s32.totalorder %s119_s0, %s66_s10  ;;  %p70_p1 = scmp.lt.u32.totalorder %s66_s10, %s119_s0 }
   0x4   :  { %p72_p2 = pnand %p70_p1, %p67_p0 }
   0x6   :  { %75 = shalt.err (!%p72_p2)
}
   0x7   :  { %s76_s15 = scalar_lea.vmem %s14_s7, 32  ;;  %p81_p4 = scmp.lt.s32.totalorder %s14_s7, %s14_s7 }
   0x8   :  { %p77_p3 = scmp.ne.s32.totalorder %s14_s7, %s76_s15  ;;  %p82_p5 = scmp.lt.s32.totalorder %s76_s15, %s76_s15 }
   0xa   :  { %p83_p6 = por %p82_p5, %p81_p4 }
   0xc   :  { %p84_p7 = pnand %p83_p6, %p77_p3 }
   0xe   :  { %87 = shalt.err (!%p84_p7)
}
   0xf   :  { %16 = dma.hbm_to_vmem [thread:$0]  %s119_s0, 32, %s14_s7, [#allocation3]  }
  0x10   :  { %88 = dma.done.wait [#allocation3], 32  }
  0x11   :  { %89 = vsyncadd [#allocation3], 4294967264  ;;  %v20_v0 = vld [vmem:[#allocation2] sm:$0x3]  ;;  %s91_s18 = smov 96   ;;  %s92_s19 = smov 112  }
  0x12   :  { %32 = vrot.lane.b32.xlu1 %v20_v0, %s91_s18  ;;  %23 = vrot.lane.b32.xlu0 %v20_v0, %s92_s19  ;;  %v21_v1 = vmul.f32 %v20_v0, %v20_v0  ;;  %s93_s20 = smov 80   ;;  %vm50_vm0 = vcmask 123904   ;;  %vm55_vm1 = vcmask 1024  }
  0x16   :  { %36 = vrot.lane.b32.xlu1 %v21_v1, %s91_s18  ;;  %28 = vrot.lane.b32.xlu0 %v21_v1, %s92_s19 }
  0x1a   :  { %44 = vrot.lane.b32.xlu1 %v21_v1, %s93_s20  ;;  %40 = vrot.lane.b32.xlu0 %v20_v0, %s93_s20 }
  0x84   :  { %v33_v2 = vpop.permute.xlu1 %32  ;;  %v24_v3 = vpop.permute.xlu0 %23 }
  0x85   :  { %v26_v4 = vadd.f32 %v24_v3, %v20_v0 }
  0x87   :  { %v35_v9 = vadd.f32 %v33_v2, %v26_v4 }
  0x88   :  { %v37_v5 = vpop.permute.xlu1 %36  ;;  %v29_v6 = vpop.permute.xlu0 %28 }
  0x89   :  { %v31_v7 = vadd.f32 %v29_v6, %v21_v1 }
  0x8b   :  { %v39_v8 = vadd.f32 %v37_v5, %v31_v7 }
  0x8c   :  { %v45_v10 = vpop.permute.xlu1 %44  ;;  %v41_v11 = vpop.permute.xlu0 %40 }
  0x8d   :  { %v43_v12 = vadd.f32 %v41_v11, %v35_v9  ;;  %v47_v13 = vadd.f32 %v45_v10, %v39_v8 }
  0x8f   :  { %v48_v14 = vmul.f32 %v43_v12, %v43_v12 }
  0x91   :  { %v49_v15 = vsub.f32 %v48_v14, %v47_v13 }
  0x93   :  { %v51_v16 = vsel %vm50_vm0, %v49_v15, 0.0 }
  0x94   :  { %52 = vadd.xlane.f32.xlu0 %v51_v16 }
 0x121   :  { %v53_v17 = vpop.xlane.xlu0 %52 }
 0x122   :  { %v54_v18 = vmul.f32 0.5, %v53_v17 }
 0x124   :  { %56 = vst.msk [vmem:[%s120_s1] sm:$0x3] %vm55_vm1, %v54_v18 }
 0x125   :  { %61 = vsyncpa [#allocation3], 1 }

</bundles_post_ra>
